<compile_context>
chip_gen: v6e
topology: v6e:2x2x1
jax: 0.10.0
libtpu: 0.0.40
codegen_flags: <defaults>
</compile_context>

<pallas_src>
import jax
import jax.numpy as jnp
from jax.experimental import pallas as pl
from jax.experimental.pallas import tpu as pltpu

# ----------------------------- configuration -------------------------------
N_QUBITS = 8          # cfg.N_QUBITS
N_A_QUBITS = 2        # cfg.N_A_QUBITS  -> 2^2 = 4 readout probabilities
IMG_SIZE = 8          # cfg.IMG_SIZE
N_CHANNELS = 1        # cfg.N_CHANNELS  -> 64 features = 2^(N_QUBITS - N_A_QUBITS)
NUM_CLASSES = 3       # cfg.NUM_CLASSES (<= 2^N_A_QUBITS)
DEPTH = 3
BATCH = 2

DIM = 2 ** N_QUBITS                        # 256
DATA_DIM = 2 ** (N_QUBITS - N_A_QUBITS)    # 64
ANC_DIM = 2 ** N_A_QUBITS                  # 4
OUT_LANES = 128                            # lane-dense kernel output width


# --------------------------- circuit glue (JAX) -----------------------------
def rot_matrix(phi, theta, omega):
    """qml.Rot(phi, theta, omega) = RZ(omega) RY(theta) RZ(phi), complex64 2x2."""
    c = jnp.cos(theta / 2.0)
    s = jnp.sin(theta / 2.0)
    e_sum_m = jnp.exp(-0.5j * (phi + omega))
    e_sum_p = jnp.exp(0.5j * (phi + omega))
    e_dif_m = jnp.exp(-0.5j * (phi - omega))
    e_dif_p = jnp.exp(0.5j * (phi - omega))
    row0 = jnp.stack([e_sum_m * c, -e_dif_p * s])
    row1 = jnp.stack([e_dif_m * s, e_sum_p * c])
    return jnp.stack([row0, row1]).astype(jnp.complex64)


def ring_cnot_permutation():
    """Basis permutation f of CNOT(0->1), CNOT(1->2), ..., CNOT(n-1->0) applied in order."""
    b = jnp.arange(DIM, dtype=jnp.int32)
    bits = [(b >> (N_QUBITS - 1 - y)) & 1 for y in range(N_QUBITS)]
    for y in range(N_QUBITS):
        t = (y + 1) % N_QUBITS
        bits[t] = bits[t] ^ bits[y]
    f = bits[0] << (N_QUBITS - 1)
    for y in range(1, N_QUBITS):
        f = f + (bits[y] << (N_QUBITS - 1 - y))
    return f


def build_total_matrix(q_params):
    """[Re(M) | Im(M)] (DIM, 2*DIM) f32 where M = M_0 @ M_1 @ ... @ M_{D-1},
    M_d = (C_ring @ kron(Rot_d0..Rot_dN-1))^T acting on row-vector states."""
    weights = q_params.reshape(DEPTH, N_QUBITS, 3)
    f = ring_cnot_permutation()
    m_total = None
    for d in range(DEPTH):
        u = jnp.ones((1, 1), jnp.complex64)
        for y in range(N_QUBITS):
            u = jnp.kron(u, rot_matrix(weights[d, y, 0],
                                       weights[d, y, 1],
                                       weights[d, y, 2]))
        # C @ U  (C[f(b), b] = 1)  == rows of U scattered to positions f
        cu = jnp.zeros((DIM, DIM), jnp.complex64).at[f].set(u)
        m_d = cu.T
        if m_total is None:
            m_total = m_d
        else:
            # Composition done wrapper-side at full precision (MXU-friendly 256^3).
            m_total = jnp.matmul(m_total, m_d,
                                 precision=jax.lax.Precision.HIGHEST)
    return jnp.concatenate(
        [jnp.real(m_total), jnp.imag(m_total)], axis=1).astype(jnp.float32)


def build_selection_matrix():
    """Lane-dense selection: S2[j, c] = 1 iff (j mod DIM) has ancilla bits == c,
    c < NUM_CLASSES, zero-padded to 128 output lanes.  Stacked twice so that
    (|re|^2 | |im|^2) @ S2 yields the ancilla marginal directly."""
    k = jnp.arange(DIM)
    anc = k % ANC_DIM
    c = jnp.arange(OUT_LANES)
    sel = ((anc[:, None] == c[None, :]) &
           (c[None, :] < NUM_CLASSES)).astype(jnp.float32)      # (DIM, 128)
    return jnp.concatenate([sel, sel], axis=0)                  # (2*DIM, 128)


# ------------------------------ Pallas kernel -------------------------------
def qnn_kernel(psi0_ref, m_ref, sel_ref, out_ref):
    x = psi0_ref[...]                                   # (B, DIM) real input
    # AmplitudeEmbedding normalize=True; rsqrt on EUP + zero-norm guard.
    sumsq = jnp.sum(x * x, axis=1, keepdims=True)
    r = x * jax.lax.rsqrt(jnp.maximum(sumsq, 1e-30))
    # Single fused real matmul: [re(psi_f) | im(psi_f)] = r @ [Re(M) | Im(M)]
    s = jnp.dot(r, m_ref[...], preferred_element_type=jnp.float32)   # (B, 2*DIM)
    p = s * s                                            # re^2 | im^2
    # Ancilla marginal (first NUM_CLASSES classes), lane-dense (B, 128)
    pu = jnp.dot(p, sel_ref[...], preferred_element_type=jnp.float32)
    denom = jnp.sum(pu, axis=1, keepdims=True)           # padding lanes are 0
    out_ref[...] = pu * pl.reciprocal(denom, approx=True)


@jax.jit
def qnn_forward(x, q_params):
    b = x.shape[0]
    x_flat = x.reshape(b, -1).astype(jnp.float32)
    pad = DATA_DIM - x_flat.shape[1]
    if pad > 0:  # AmplitudeEmbedding pad_with=0
        x_flat = jnp.pad(x_flat, ((0, 0), (0, pad)))
    # kron(psi_data, |0...0>_anc): data amplitudes sit at indices i * ANC_DIM
    psi0 = jnp.zeros((b, DIM), jnp.float32).at[:, ::ANC_DIM].set(x_flat)

    m_cat = build_total_matrix(q_params)     # (DIM, 2*DIM)
    sel = build_selection_matrix()           # (2*DIM, OUT_LANES)

    probs = pl.pallas_call(
        qnn_kernel,
        out_shape=jax.ShapeDtypeStruct((b, OUT_LANES), jnp.float32),
        grid=(1,),
        in_specs=[
            pl.BlockSpec((b, DIM), lambda i: (0, 0)),
            pl.BlockSpec((DIM, 2 * DIM), lambda i: (0, 0)),
            pl.BlockSpec((2 * DIM, OUT_LANES), lambda i: (0, 0)),
        ],
        out_specs=pl.BlockSpec((b, OUT_LANES), lambda i: (0, 0)),
        compiler_params=pltpu.CompilerParams(
            dimension_semantics=("arbitrary",),
            vmem_limit_bytes=8 * 1024 * 1024,
        ),
    )(psi0, m_cat, sel)
    return probs[:, :NUM_CLASSES]


# ----------------------- pure-JAX reference (sanity) ------------------------
def reference_forward(x, q_params):
    b = x.shape[0]
    xf = x.reshape(b, -1).astype(jnp.float32)
    data = xf / jnp.linalg.norm(xf, axis=1, keepdims=True)
    psi = jnp.zeros((b, DIM), jnp.complex64).at[:, ::ANC_DIM].set(
        data.astype(jnp.complex64))
    w = q_params.reshape(DEPTH, N_QUBITS, 3)
    hp = jax.lax.Precision.HIGHEST
    for d in range(DEPTH):
        for y in range(N_QUBITS):
            u = rot_matrix(w[d, y, 0], w[d, y, 1], w[d, y, 2])
            psi = psi.reshape(b, 2 ** y, 2, 2 ** (N_QUBITS - 1 - y))
            psi = jnp.einsum('ab,kibj->kiaj', u, psi,
                             precision=hp).reshape(b, DIM)
        for y in range(N_QUBITS):
            t = (y + 1) % N_QUBITS
            j = jnp.arange(DIM)
            cbit = (j >> (N_QUBITS - 1 - y)) & 1
            g = j ^ (cbit << (N_QUBITS - 1 - t))
            psi = psi[:, g]
    p = jnp.abs(psi) ** 2
    marg = p.reshape(b, DATA_DIM, ANC_DIM).sum(axis=1)
    preds = marg[:, :NUM_CLASSES]
    return preds / preds.sum(axis=1, keepdims=True)


# ---------------------------------- main ------------------------------------
if __name__ == "__main__":
    key = jax.random.PRNGKey(0)
    kp, kx = jax.random.split(key)
    # mode='train' init: 4*pi*rand(depth*qubits*3)
    q_params = 4.0 * jnp.pi * jax.random.uniform(
        kp, (DEPTH * N_QUBITS * 3,), dtype=jnp.float32)
    # NCHW input, like the torch module
    x = jax.random.normal(kx, (BATCH, N_CHANNELS, IMG_SIZE, IMG_SIZE),
                          dtype=jnp.float32)

    preds = jax.block_until_ready(qnn_forward(x, q_params))
    ref = jax.block_until_ready(reference_forward(x, q_params))

    assert preds.shape == (BATCH, NUM_CLASSES)
    assert bool(jnp.all(jnp.isfinite(preds)))
    assert bool(jnp.allclose(preds, ref, atol=2e-3, rtol=2e-2)), (preds, ref)
    print("KERNEL_OK")
</pallas_src>

<mosaic_0001>
module attributes {stable_mosaic.version = 11 : i64} {
  func.func @qnn_kernel(%arg0: i32, %arg1: memref<2x256xf32, #tpu.memory_space<vmem>>, %arg2: memref<256x512xf32, #tpu.memory_space<vmem>>, %arg3: memref<512x128xf32, #tpu.memory_space<vmem>>, %arg4: memref<2x128xf32, #tpu.memory_space<vmem>>) attributes {dimension_semantics = [#tpu.dimension_semantics<arbitrary>], iteration_bounds = array<i64: 1>, scalar_prefetch = 0 : i64, scratch_operands = 0 : i64, tpu.core_type = #tpu.core_type<tc>, window_params = [{pipeline_mode = #tpu.pipeline_mode<synchronous>, transform_indices = @transform_0, window_bounds = array<i64: 2, 256>}, {pipeline_mode = #tpu.pipeline_mode<synchronous>, transform_indices = @transform_1, window_bounds = array<i64: 256, 512>}, {pipeline_mode = #tpu.pipeline_mode<synchronous>, transform_indices = @transform_2, window_bounds = array<i64: 512, 128>}, {pipeline_mode = #tpu.pipeline_mode<synchronous>, transform_indices = @transform_3, window_bounds = array<i64: 2, 128>}]} {
    %c0 = arith.constant 0 : index
    %c0_0 = arith.constant 0 : index
    %0 = vector.load %arg1[%c0, %c0_0] : memref<2x256xf32, #tpu.memory_space<vmem>>, vector<2x256xf32>
    %1 = arith.mulf %0, %0 : vector<2x256xf32>
    %cst = arith.constant dense<0.000000e+00> : vector<2xf32>
    %2 = vector.multi_reduction <add>, %1, %cst [1] : vector<2x256xf32> to vector<2xf32>
    %3 = vector.shape_cast %2 : vector<2xf32> to vector<2x1xf32>
    %cst_1 = arith.constant 1.000000e-30 : f32
    %4 = vector.broadcast %cst_1 : f32 to vector<2x1xf32>
    %5 = arith.maximumf %3, %4 : vector<2x1xf32>
    %6 = math.rsqrt %5 : vector<2x1xf32>
    %7 = vector.broadcast %6 : vector<2x1xf32> to vector<2x256xf32>
    %8 = arith.mulf %0, %7 : vector<2x256xf32>
    %c0_2 = arith.constant 0 : index
    %c0_3 = arith.constant 0 : index
    %9 = vector.load %arg2[%c0_2, %c0_3] : memref<256x512xf32, #tpu.memory_space<vmem>>, vector<256x512xf32>
    %cst_4 = arith.constant dense<0.000000e+00> : vector<2x512xf32>
    %10 = tpu.matmul %8, %9, %cst_4 {dimension_numbers = #tpu.dot_dimension_numbers<[1], [0], [0], [1], [0, 0, 1, 1], [], []>} : vector<2x256xf32>, vector<256x512xf32>, vector<2x512xf32> -> vector<2x512xf32>
    %11 = arith.mulf %10, %10 : vector<2x512xf32>
    %c0_5 = arith.constant 0 : index
    %c0_6 = arith.constant 0 : index
    %12 = vector.load %arg3[%c0_5, %c0_6] : memref<512x128xf32, #tpu.memory_space<vmem>>, vector<512x128xf32>
    %cst_7 = arith.constant dense<0.000000e+00> : vector<2x128xf32>
    %13 = tpu.matmul %11, %12, %cst_7 {dimension_numbers = #tpu.dot_dimension_numbers<[1], [0], [0], [1], [0, 0, 1, 1], [], []>} : vector<2x512xf32>, vector<512x128xf32>, vector<2x128xf32> -> vector<2x128xf32>
    %cst_8 = arith.constant dense<0.000000e+00> : vector<2xf32>
    %14 = vector.multi_reduction <add>, %13, %cst_8 [1] : vector<2x128xf32> to vector<2xf32>
    %15 = vector.shape_cast %14 : vector<2xf32> to vector<2x1xf32>
    %16 = tpu.reciprocal %15 {approx = true} : vector<2x1xf32> -> vector<2x1xf32>
    %17 = vector.broadcast %16 : vector<2x1xf32> to vector<2x128xf32>
    %18 = arith.mulf %13, %17 : vector<2x128xf32>
    %c0_9 = arith.constant 0 : index
    %c0_10 = arith.constant 0 : index
    %19 = vector.load %arg4[%c0_9, %c0_10] : memref<2x128xf32, #tpu.memory_space<vmem>>, vector<2x128xf32>
    tpu.vector_store %arg4[%c0_9, %c0_10], %18 {strides = array<i32>} : memref<2x128xf32, #tpu.memory_space<vmem>>, vector<2x128xf32>,
    return
  }
  func.func @transform_0(%arg0: i32) -> (i32, i32) {
    %c0_i32 = arith.constant 0 : i32
    %c0_i32_0 = arith.constant 0 : i32
    %c0_i32_1 = arith.constant 0 : i32
    return %c0_i32, %c0_i32_0 : i32, i32
  }
  func.func @transform_1(%arg0: i32) -> (i32, i32) {
    %c0_i32 = arith.constant 0 : i32
    %c0_i32_0 = arith.constant 0 : i32
    %c0_i32_1 = arith.constant 0 : i32
    return %c0_i32, %c0_i32_0 : i32, i32
  }
  func.func @transform_2(%arg0: i32) -> (i32, i32) {
    %c0_i32 = arith.constant 0 : i32
    %c0_i32_0 = arith.constant 0 : i32
    %c0_i32_1 = arith.constant 0 : i32
    return %c0_i32, %c0_i32_0 : i32, i32
  }
  func.func @transform_3(%arg0: i32) -> (i32, i32) {
    %c0_i32 = arith.constant 0 : i32
    %c0_i32_0 = arith.constant 0 : i32
    %c0_i32_1 = arith.constant 0 : i32
    return %c0_i32, %c0_i32_0 : i32, i32
  }
}

</mosaic_0001>

<bundles_post_ra>
// kernel: qnn_forward.1
= control target key start
LH: loop header
LB: loop body
LE: loop exit
PB: predicated region body
PF: predicated region fallthrough
CT: control target
= control target key end

     0   :  { %v21_v1 = vlaneseq  ;;  %v654_v3 = vmov 1983009808   ;;  %vm28_vm0 = vcmask 1041408   ;;  %s1275_s0 = inlined_call_operand.vmem [shape: f32[2,256], index: 0, kind: input, shape index: {}]   ;;  %s1276_s1 = inlined_call_operand.vmem [shape: f32[256,512], index: 1, kind: input, shape index: {}]   ;;  %s1277_s2 = inlined_call_operand.vmem [shape: f32[512,128], index: 2, kind: input, shape index: {}]   ;;  %s1278_s3 = inlined_call_operand.hbm [shape: f32[2,128], index: 3, kind: output, shape index: {}]  }
   0x1   :  { %v680_v0 = vld [vmem:[%s1275_s0] sm:$0xf]  ;;  %v107_v2 = vld [vmem:[%s1276_s1 + $0x1e8] sm:$0xff]  ;;  %v19_v4 = vunpack.c.l.s4 %v654_v3  ;;  %v109_v5 = vld [vmem:[%s1276_s1 + $0x1f8] sm:$0xff] }
   0x2   :  { %185 = vmatprep.subr.mxu0 %v107_v2  ;;  %v106_v6 = vld [vmem:[%s1276_s1 + $0x1e0] sm:$0xff]  ;;  %v108_v7 = vld [vmem:[%s1276_s1 + $0x1f0] sm:$0xff]  ;;  %v694_v8 = vshrl.u32 %v21_v1, 7  ;;  %256 = vmatprep.subr.mxu1 %v109_v5  ;;  %v103_v9 = vld [vmem:[%s1276_s1 + $0x1c8] sm:$0xff]  ;;  %v16_v12 = vmul.f32 %v680_v0, %v680_v0 }
   0x3   :  { %186 = vmatpush1.msra.mxu0 %v106_v6  ;;  %v105_v10 = vld [vmem:[%s1276_s1 + $0x1d8] sm:$0xff]  ;;  %v102_v11 = vld [vmem:[%s1276_s1 + $0x1c0] sm:$0xff]  ;;  %v20_v13 = vunpack.c.0.s8 %v19_v4  ;;  %257 = vmatpush1.msra.mxu1 %v108_v7  ;;  %v104_v14 = vld [vmem:[%s1276_s1 + $0x1d0] sm:$0xff] }
   0x4   :  { %187 = vmatprep.subr.mxu0 %v103_v9  ;;  %v99_v15 = vld [vmem:[%s1276_s1 + $0x1a8] sm:$0xff]  ;;  %v101_v16 = vld [vmem:[%s1276_s1 + $0x1b8] sm:$0xff]  ;;  %258 = vmatprep.subr.mxu1 %v105_v10  ;;  %v98_v17 = vld [vmem:[%s1276_s1 + $0x1a0] sm:$0xff] }
   0x5   :  { %188 = vmatpush1.msra.mxu0 %v102_v11  ;;  %v100_v18 = vld [vmem:[%s1276_s1 + $0x1b0] sm:$0xff]  ;;  %v95_v19 = vld [vmem:[%s1276_s1 + $0x188] sm:$0xff]  ;;  %v726_v20 = vsub.s32 %v20_v13, %v694_v8  ;;  %259 = vmatpush1.msra.mxu1 %v104_v14  ;;  %v97_v21 = vld [vmem:[%s1276_s1 + $0x198] sm:$0xff] }
   0x6   :  { %189 = vmatprep.subr.mxu0 %v99_v15  ;;  %v94_v22 = vld [vmem:[%s1276_s1 + $0x180] sm:$0xff]  ;;  %260 = vmatprep.subr.mxu1 %v101_v16  ;;  %v96_v23 = vld [vmem:[%s1276_s1 + $0x190] sm:$0xff]  ;;  %v91_v24 = vld [vmem:[%s1276_s1 + $0x168] sm:$0xff] }
   0x7   :  { %190 = vmatpush1.msra.mxu0 %v98_v17  ;;  %v24_v25 = vrot.slane %v16_v12, %v726_v20  ;;  %261 = vmatpush1.msra.mxu1 %v100_v18  ;;  %v93_v26 = vld [vmem:[%s1276_s1 + $0x178] sm:$0xff]  ;;  %v90_v27 = vld [vmem:[%s1276_s1 + $0x160] sm:$0xff]  ;;  %v92_v28 = vld [vmem:[%s1276_s1 + $0x170] sm:$0xff] }
   0x8   :  { %191 = vmatprep.subr.mxu0 %v95_v19  ;;  %262 = vmatprep.subr.mxu1 %v97_v21  ;;  %v87_v29 = vld [vmem:[%s1276_s1 + $0x148] sm:$0xff]  ;;  %v89_v32 = vld [vmem:[%s1276_s1 + $0x158] sm:$0xff]  ;;  %v86_v33 = vld [vmem:[%s1276_s1 + $0x140] sm:$0xff] }
   0x9   :  { %192 = vmatpush1.msra.mxu0 %v94_v22  ;;  %v25_v30 = vcombine.high %v24_v25, %v24_v25  ;;  %v29_v31 = vsel %vm28_vm0, %v24_v25, 0.0  ;;  %263 = vmatpush1.msra.mxu1 %v96_v23  ;;  %v88_v34 = vld [vmem:[%s1276_s1 + $0x150] sm:$0xff]  ;;  %v83_v35 = vld [vmem:[%s1276_s1 + $0x128] sm:$0xff]  ;;  %v85_v37 = vld [vmem:[%s1276_s1 + $0x138] sm:$0xff] }
   0xa   :  { %193 = vmatprep.subr.mxu0 %v91_v24  ;;  %264 = vmatprep.subr.mxu1 %v93_v26  ;;  %v82_v39 = vld [vmem:[%s1276_s1 + $0x120] sm:$0xff]  ;;  %v84_v40 = vld [vmem:[%s1276_s1 + $0x130] sm:$0xff]  ;;  %v79_v41 = vld [vmem:[%s1276_s1 + $0x108] sm:$0xff] }
   0xb   :  { %194 = vmatpush1.msra.mxu0 %v90_v27  ;;  %v30_v36 = vsel %vm28_vm0, %v25_v30, 0.0  ;;  %265 = vmatpush1.msra.mxu1 %v92_v28  ;;  %v81_v42 = vld [vmem:[%s1276_s1 + $0x118] sm:$0xff]  ;;  %v78_v43 = vld [vmem:[%s1276_s1 + $0x100] sm:$0xff]  ;;  %v80_v44 = vld [vmem:[%s1276_s1 + $0x110] sm:$0xff] }
   0xc   :  { %195 = vmatprep.subr.mxu0 %v87_v29  ;;  %v31_v38 = vadd.f32 %v30_v36, %v29_v31  ;;  %266 = vmatprep.subr.mxu1 %v89_v32  ;;  %v75_v45 = vld [vmem:[%s1276_s1 + $0xe8] sm:$0xff]  ;;  %v77_v46 = vld [vmem:[%s1276_s1 + $0xf8] sm:$0xff]  ;;  %v74_v47 = vld [vmem:[%s1276_s1 + $0xe0] sm:$0xff] }
   0xd   :  { %196 = vmatpush1.msra.mxu0 %v86_v33  ;;  %267 = vmatpush1.msra.mxu1 %v88_v34  ;;  %v76_v48 = vld [vmem:[%s1276_s1 + $0xf0] sm:$0xff]  ;;  %v71_v49 = vld [vmem:[%s1276_s1 + $0xc8] sm:$0xff]  ;;  %v73_v50 = vld [vmem:[%s1276_s1 + $0xd8] sm:$0xff] }
   0xe   :  { %197 = vmatprep.subr.mxu0 %v83_v35  ;;  %32 = vadd.xlane.f32.xlu0 %v31_v38  ;;  %v70_v51 = vld [vmem:[%s1276_s1 + $0xc0] sm:$0xff]  ;;  %v72_v52 = vld [vmem:[%s1276_s1 + $0xd0] sm:$0xff]  ;;  %v67_v53 = vld [vmem:[%s1276_s1 + $0xa8] sm:$0xff] }
   0xf   :  { %268 = vmatprep.subr.mxu1 %v85_v37  ;;  %198 = vmatpush1.msra.mxu0 %v82_v39  ;;  %v69_v54 = vld [vmem:[%s1276_s1 + $0xb8] sm:$0xff]  ;;  %v66_v55 = vld [vmem:[%s1276_s1 + $0xa0] sm:$0xff]  ;;  %v68_v56 = vld [vmem:[%s1276_s1 + $0xb0] sm:$0xff] }
  0x10   :  { %269 = vmatpush1.msra.mxu1 %v84_v40  ;;  %199 = vmatprep.subr.mxu0 %v79_v41  ;;  %v63_v57 = vld [vmem:[%s1276_s1 + $0x88] sm:$0xff]  ;;  %v65_v58 = vld [vmem:[%s1276_s1 + $0x98] sm:$0xff]  ;;  %v62_v59 = vld [vmem:[%s1276_s1 + $0x80] sm:$0xff] }
  0x11   :  { %270 = vmatprep.subr.mxu1 %v81_v42  ;;  %200 = vmatpush1.msra.mxu0 %v78_v43  ;;  %v64_v60 = vld [vmem:[%s1276_s1 + $0x90] sm:$0xff]  ;;  %v59_v61 = vld [vmem:[%s1276_s1 + $0x68] sm:$0xff]  ;;  %v61_v62 = vld [vmem:[%s1276_s1 + $0x78] sm:$0xff] }
  0x12   :  { %271 = vmatpush1.msra.mxu1 %v80_v44  ;;  %201 = vmatprep.subr.mxu0 %v75_v45  ;;  %v58_v63 = vld [vmem:[%s1276_s1 + $0x60] sm:$0xff]  ;;  %v60_v1 = vld [vmem:[%s1276_s1 + $0x70] sm:$0xff]  ;;  %v55_v2 = vld [vmem:[%s1276_s1 + $0x48] sm:$0xff] }
  0x13   :  { %272 = vmatprep.subr.mxu1 %v77_v46  ;;  %202 = vmatpush1.msra.mxu0 %v74_v47  ;;  %v57_v3 = vld [vmem:[%s1276_s1 + $0x58] sm:$0xff]  ;;  %v54_v4 = vld [vmem:[%s1276_s1 + $0x40] sm:$0xff]  ;;  %v56_v5 = vld [vmem:[%s1276_s1 + $0x50] sm:$0xff] }
  0x14   :  { %273 = vmatpush1.msra.mxu1 %v76_v48  ;;  %203 = vmatprep.subr.mxu0 %v71_v49  ;;  %v51_v6 = vld [vmem:[%s1276_s1 + $0x28] sm:$0xff]  ;;  %v53_v7 = vld [vmem:[%s1276_s1 + $0x38] sm:$0xff]  ;;  %v50_v9 = vld [vmem:[%s1276_s1 + $0x20] sm:$0xff] }
  0x15   :  { %274 = vmatprep.subr.mxu1 %v73_v50  ;;  %204 = vmatpush1.msra.mxu0 %v70_v51  ;;  %v52_v10 = vld [vmem:[%s1276_s1 + $0x30] sm:$0xff]  ;;  %v47_v11 = vld [vmem:[%s1276_s1 + $0x8] sm:$0xff]  ;;  %v49_v12 = vld [vmem:[%s1276_s1 + $0x18] sm:$0xff] }
  0x16   :  { %275 = vmatpush1.msra.mxu1 %v72_v52  ;;  %205 = vmatprep.subr.mxu0 %v67_v53  ;;  %v46_v13 = vld [vmem:[%s1276_s1] sm:$0xff]  ;;  %v48_v14 = vld [vmem:[%s1276_s1 + $0x10] sm:$0xff]  ;;  %v171_v15 = vld [vmem:[%s1276_s1 + $0x3e8] sm:$0xff] }
  0x17   :  { %276 = vmatprep.subr.mxu1 %v69_v54  ;;  %206 = vmatpush1.msra.mxu0 %v66_v55  ;;  %v173_v16 = vld [vmem:[%s1276_s1 + $0x3f8] sm:$0xff]  ;;  %v170_v17 = vld [vmem:[%s1276_s1 + $0x3e0] sm:$0xff]  ;;  %v172_v18 = vld [vmem:[%s1276_s1 + $0x3f0] sm:$0xff] }
  0x18   :  { %277 = vmatpush1.msra.mxu1 %v68_v56  ;;  %207 = vmatprep.subr.mxu0 %v63_v57  ;;  %v167_v19 = vld [vmem:[%s1276_s1 + $0x3c8] sm:$0xff]  ;;  %v169_v21 = vld [vmem:[%s1276_s1 + $0x3d8] sm:$0xff]  ;;  %v166_v22 = vld [vmem:[%s1276_s1 + $0x3c0] sm:$0xff] }
  0x19   :  { %278 = vmatprep.subr.mxu1 %v65_v58  ;;  %208 = vmatpush1.msra.mxu0 %v62_v59  ;;  %v168_v23 = vld [vmem:[%s1276_s1 + $0x3d0] sm:$0xff]  ;;  %v163_v24 = vld [vmem:[%s1276_s1 + $0x3a8] sm:$0xff]  ;;  %v165_v25 = vld [vmem:[%s1276_s1 + $0x3b8] sm:$0xff] }
  0x1a   :  { %279 = vmatpush1.msra.mxu1 %v64_v60  ;;  %209 = vmatprep.subr.mxu0 %v59_v61  ;;  %v162_v26 = vld [vmem:[%s1276_s1 + $0x3a0] sm:$0xff]  ;;  %v164_v27 = vld [vmem:[%s1276_s1 + $0x3b0] sm:$0xff]  ;;  %v159_v28 = vld [vmem:[%s1276_s1 + $0x388] sm:$0xff] }
  0x1b   :  { %280 = vmatprep.subr.mxu1 %v61_v62  ;;  %210 = vmatpush1.msra.mxu0 %v58_v63  ;;  %v161_v29 = vld [vmem:[%s1276_s1 + $0x398] sm:$0xff]  ;;  %v158_v30 = vld [vmem:[%s1276_s1 + $0x380] sm:$0xff]  ;;  %v160_v31 = vld [vmem:[%s1276_s1 + $0x390] sm:$0xff] }
  0x1c   :  { %281 = vmatpush1.msra.mxu1 %v60_v1  ;;  %211 = vmatprep.subr.mxu0 %v55_v2  ;;  %v155_v32 = vld [vmem:[%s1276_s1 + $0x368] sm:$0xff]  ;;  %v157_v33 = vld [vmem:[%s1276_s1 + $0x378] sm:$0xff]  ;;  %v154_v34 = vld [vmem:[%s1276_s1 + $0x360] sm:$0xff] }
  0x1d   :  { %282 = vmatprep.subr.mxu1 %v57_v3  ;;  %212 = vmatpush1.msra.mxu0 %v54_v4  ;;  %v156_v35 = vld [vmem:[%s1276_s1 + $0x370] sm:$0xff]  ;;  %v151_v36 = vld [vmem:[%s1276_s1 + $0x348] sm:$0xff]  ;;  %v153_v37 = vld [vmem:[%s1276_s1 + $0x358] sm:$0xff] }
  0x1e   :  { %283 = vmatpush1.msra.mxu1 %v56_v5  ;;  %213 = vmatprep.subr.mxu0 %v51_v6  ;;  %v150_v38 = vld [vmem:[%s1276_s1 + $0x340] sm:$0xff]  ;;  %v152_v39 = vld [vmem:[%s1276_s1 + $0x350] sm:$0xff]  ;;  %v147_v40 = vld [vmem:[%s1276_s1 + $0x328] sm:$0xff] }
  0x1f   :  { %284 = vmatprep.subr.mxu1 %v53_v7  ;;  %214 = vmatpush1.msra.mxu0 %v50_v9  ;;  %v149_v41 = vld [vmem:[%s1276_s1 + $0x338] sm:$0xff] }
  0x20   :  { %285 = vmatpush1.msra.mxu1 %v52_v10  ;;  %215 = vmatprep.subr.mxu0 %v47_v11 }
  0x21   :  { %286 = vmatprep.subr.mxu1 %v49_v12  ;;  %216 = vmatpush1.msra.mxu0 %v46_v13 }
  0x22   :  { %287 = vmatpush1.msra.mxu1 %v48_v14  ;;  %217 = vmatprep.subr.mxu0 %v171_v15 }
  0x23   :  { %288 = vmatprep.subr.mxu1 %v173_v16  ;;  %218 = vmatpush2.msra.mxu0 %v170_v17 }
  0x24   :  { %289 = vmatpush2.msra.mxu1 %v172_v18  ;;  %219 = vmatprep.subr.mxu0 %v167_v19 }
  0x25   :  { %290 = vmatprep.subr.mxu1 %v169_v21  ;;  %220 = vmatpush2.msra.mxu0 %v166_v22 }
  0x26   :  { %291 = vmatpush2.msra.mxu1 %v168_v23  ;;  %221 = vmatprep.subr.mxu0 %v163_v24 }
  0x27   :  { %292 = vmatprep.subr.mxu1 %v165_v25  ;;  %222 = vmatpush2.msra.mxu0 %v162_v26 }
  0x28   :  { %293 = vmatpush2.msra.mxu1 %v164_v27  ;;  %223 = vmatprep.subr.mxu0 %v159_v28 }
  0x29   :  { %294 = vmatprep.subr.mxu1 %v161_v29  ;;  %224 = vmatpush2.msra.mxu0 %v158_v30 }
  0x2a   :  { %295 = vmatpush2.msra.mxu1 %v160_v31  ;;  %225 = vmatprep.subr.mxu0 %v155_v32 }
  0x2b   :  { %296 = vmatprep.subr.mxu1 %v157_v33  ;;  %226 = vmatpush2.msra.mxu0 %v154_v34 }
  0x2c   :  { %297 = vmatpush2.msra.mxu1 %v156_v35 }
  0x2d   :  { %8 = vsyncpa [#allocation3], 0  ;;  %227 = vmatprep.subr.mxu0 %v151_v36  ;;  %298 = vmatprep.subr.mxu1 %v153_v37  ;;  %v146_v42 = vld [vmem:[%s1276_s1 + $0x320] sm:$0xff]  ;;  %v148_v43 = vld [vmem:[%s1276_s1 + $0x330] sm:$0xff]  ;;  %v655_v23 = vmov 269488144  }
  0x2e   :  { %228 = vmatpush2.msra.mxu0 %v150_v38  ;;  %299 = vmatpush2.msra.mxu1 %v152_v39  ;;  %v143_v44 = vld [vmem:[%s1276_s1 + $0x308] sm:$0xff]  ;;  %v145_v45 = vld [vmem:[%s1276_s1 + $0x318] sm:$0xff]  ;;  %v142_v46 = vld [vmem:[%s1276_s1 + $0x300] sm:$0xff]  ;;  %v38_v24 = vunpack.c.l.s4 %v655_v23 }
  0x2f   :  { %229 = vmatprep.subr.mxu0 %v147_v40  ;;  %300 = vmatprep.subr.mxu1 %v149_v41  ;;  %v144_v47 = vld [vmem:[%s1276_s1 + $0x310] sm:$0xff]  ;;  %v139_v48 = vld [vmem:[%s1276_s1 + $0x2e8] sm:$0xff]  ;;  %v141_v49 = vld [vmem:[%s1276_s1 + $0x2f8] sm:$0xff] }
  0x30   :  { %230 = vmatpush2.msra.mxu0 %v146_v42  ;;  %301 = vmatpush2.msra.mxu1 %v148_v43  ;;  %v138_v50 = vld [vmem:[%s1276_s1 + $0x2e0] sm:$0xff]  ;;  %v140_v51 = vld [vmem:[%s1276_s1 + $0x2f0] sm:$0xff]  ;;  %v135_v52 = vld [vmem:[%s1276_s1 + $0x2c8] sm:$0xff]  ;;  %v39_v25 = vunpack.c.0.s8 %v38_v24 }
  0x31   :  { %231 = vmatprep.subr.mxu0 %v143_v44  ;;  %302 = vmatprep.subr.mxu1 %v145_v45  ;;  %v137_v53 = vld [vmem:[%s1276_s1 + $0x2d8] sm:$0xff]  ;;  %v134_v54 = vld [vmem:[%s1276_s1 + $0x2c0] sm:$0xff]  ;;  %v136_v55 = vld [vmem:[%s1276_s1 + $0x2d0] sm:$0xff] }
  0x32   :  { %232 = vmatpush2.msra.mxu0 %v142_v46  ;;  %303 = vmatpush2.msra.mxu1 %v144_v47  ;;  %v131_v56 = vld [vmem:[%s1276_s1 + $0x2a8] sm:$0xff]  ;;  %v133_v57 = vld [vmem:[%s1276_s1 + $0x2b8] sm:$0xff]  ;;  %v130_v58 = vld [vmem:[%s1276_s1 + $0x2a0] sm:$0xff]  ;;  %v42_v26 = vsub.s32 %v39_v25, %v694_v8 }
  0x33   :  { %233 = vmatprep.subr.mxu0 %v139_v48  ;;  %304 = vmatprep.subr.mxu1 %v141_v49  ;;  %v132_v59 = vld [vmem:[%s1276_s1 + $0x2b0] sm:$0xff]  ;;  %v127_v60 = vld [vmem:[%s1276_s1 + $0x288] sm:$0xff]  ;;  %v129_v61 = vld [vmem:[%s1276_s1 + $0x298] sm:$0xff] }
  0x34   :  { %234 = vmatpush2.msra.mxu0 %v138_v50  ;;  %305 = vmatpush2.msra.mxu1 %v140_v51  ;;  %v126_v62 = vld [vmem:[%s1276_s1 + $0x280] sm:$0xff]  ;;  %v128_v63 = vld [vmem:[%s1276_s1 + $0x290] sm:$0xff]  ;;  %v123_v1 = vld [vmem:[%s1276_s1 + $0x268] sm:$0xff] }
  0x35   :  { %235 = vmatprep.subr.mxu0 %v135_v52  ;;  %306 = vmatprep.subr.mxu1 %v137_v53  ;;  %v125_v2 = vld [vmem:[%s1276_s1 + $0x278] sm:$0xff]  ;;  %v122_v3 = vld [vmem:[%s1276_s1 + $0x260] sm:$0xff]  ;;  %v124_v4 = vld [vmem:[%s1276_s1 + $0x270] sm:$0xff] }
  0x36   :  { %236 = vmatpush2.msra.mxu0 %v134_v54  ;;  %307 = vmatpush2.msra.mxu1 %v136_v55  ;;  %v119_v5 = vld [vmem:[%s1276_s1 + $0x248] sm:$0xff]  ;;  %v121_v6 = vld [vmem:[%s1276_s1 + $0x258] sm:$0xff]  ;;  %v118_v7 = vld [vmem:[%s1276_s1 + $0x240] sm:$0xff] }
  0x37   :  { %237 = vmatprep.subr.mxu0 %v131_v56  ;;  %308 = vmatprep.subr.mxu1 %v133_v57  ;;  %v120_v9 = vld [vmem:[%s1276_s1 + $0x250] sm:$0xff]  ;;  %v115_v10 = vld [vmem:[%s1276_s1 + $0x228] sm:$0xff]  ;;  %v117_v11 = vld [vmem:[%s1276_s1 + $0x238] sm:$0xff] }
  0x38   :  { %238 = vmatpush2.msra.mxu0 %v130_v58  ;;  %309 = vmatpush2.msra.mxu1 %v132_v59  ;;  %v114_v12 = vld [vmem:[%s1276_s1 + $0x220] sm:$0xff]  ;;  %v116_v13 = vld [vmem:[%s1276_s1 + $0x230] sm:$0xff]  ;;  %v111_v14 = vld [vmem:[%s1276_s1 + $0x208] sm:$0xff] }
  0x39   :  { %239 = vmatprep.subr.mxu0 %v127_v60  ;;  %310 = vmatprep.subr.mxu1 %v129_v61  ;;  %v113_v15 = vld [vmem:[%s1276_s1 + $0x218] sm:$0xff]  ;;  %v110_v16 = vld [vmem:[%s1276_s1 + $0x200] sm:$0xff]  ;;  %v112_v17 = vld [vmem:[%s1276_s1 + $0x210] sm:$0xff] }
  0x3a   :  { %240 = vmatpush2.msra.mxu0 %v126_v62  ;;  %311 = vmatpush2.msra.mxu1 %v128_v63  ;;  %v362_v18 = vld [vmem:[%s1277_s2 + $0xf8] sm:$0xff]  ;;  %v361_v8 = vld [vmem:[%s1277_s2 + $0xf0] sm:$0xff]  ;;  %v360_v35 = vld [vmem:[%s1277_s2 + $0xe8] sm:$0xff] }
  0x3b   :  { %241 = vmatprep.subr.mxu0 %v123_v1  ;;  %312 = vmatprep.subr.mxu1 %v125_v2  ;;  %v394_v19 = vld [vmem:[%s1277_s2 + $0x1f8] sm:$0xff]  ;;  %v377_v34 = vld [vmem:[%s1277_s2 + $0x170] sm:$0xff]  ;;  %v392_v36 = vld [vmem:[%s1277_s2 + $0x1e8] sm:$0xff] }
  0x3c   :  { %242 = vmatpush2.msra.mxu0 %v122_v3  ;;  %313 = vmatpush2.msra.mxu1 %v124_v4  ;;  %v346_v32 = vld [vmem:[%s1277_s2 + $0x78] sm:$0xff]  ;;  %v344_v37 = vld [vmem:[%s1277_s2 + $0x68] sm:$0xff]  ;;  %v359_v39 = vld [vmem:[%s1277_s2 + $0xe0] sm:$0xff] }
  0x3d   :  { %243 = vmatprep.subr.mxu0 %v119_v5  ;;  %314 = vmatprep.subr.mxu1 %v121_v6  ;;  %v378_v33 = vld [vmem:[%s1277_s2 + $0x178] sm:$0xff]  ;;  %v376_v38 = vld [vmem:[%s1277_s2 + $0x168] sm:$0xff]  ;;  %v391_v40 = vld [vmem:[%s1277_s2 + $0x1e0] sm:$0xff] }
  0x3e   :  { %244 = vmatpush2.msra.mxu0 %v118_v7  ;;  %315 = vmatpush2.msra.mxu1 %v120_v9  ;;  %v343_v41 = vld [vmem:[%s1277_s2 + $0x60] sm:$0xff]  ;;  %v358_v43 = vld [vmem:[%s1277_s2 + $0xd8] sm:$0xff]  ;;  %v357_v47 = vld [vmem:[%s1277_s2 + $0xd0] sm:$0xff] }
  0x3f   :  { %245 = vmatprep.subr.mxu0 %v115_v10  ;;  %316 = vmatprep.subr.mxu1 %v117_v11  ;;  %v375_v42 = vld [vmem:[%s1277_s2 + $0x160] sm:$0xff]  ;;  %v390_v44 = vld [vmem:[%s1277_s2 + $0x1d8] sm:$0xff]  ;;  %v389_v48 = vld [vmem:[%s1277_s2 + $0x1d0] sm:$0xff] }
  0x40   :  { %246 = vmatpush2.msra.mxu0 %v114_v12  ;;  %317 = vmatpush2.msra.mxu1 %v116_v13  ;;  %v342_v45 = vld [vmem:[%s1277_s2 + $0x58] sm:$0xff]  ;;  %v341_v49 = vld [vmem:[%s1277_s2 + $0x50] sm:$0xff]  ;;  %v356_v51 = vld [vmem:[%s1277_s2 + $0xc8] sm:$0xff] }
  0x41   :  { %247 = vmatprep.subr.mxu0 %v111_v14  ;;  %318 = vmatprep.subr.mxu1 %v113_v15  ;;  %v374_v46 = vld [vmem:[%s1277_s2 + $0x158] sm:$0xff]  ;;  %v373_v50 = vld [vmem:[%s1277_s2 + $0x150] sm:$0xff]  ;;  %v388_v52 = vld [vmem:[%s1277_s2 + $0x1c8] sm:$0xff] }
  0x42   :  { %248 = vmatpush2.msra.mxu0 %v110_v16  ;;  %319 = vmatpush2.msra.mxu1 %v112_v17  ;;  %v340_v53 = vld [vmem:[%s1277_s2 + $0x48] sm:$0xff]  ;;  %v355_v55 = vld [vmem:[%s1277_s2 + $0xc0] sm:$0xff]  ;;  %v354_v59 = vld [vmem:[%s1277_s2 + $0xb8] sm:$0xff] }
  0x43   :  { %555 = vmatprep.subr.mxu0 %v362_v18  ;;  %590 = vmatprep.subr.mxu1 %v394_v19  ;;  %v372_v54 = vld [vmem:[%s1277_s2 + $0x148] sm:$0xff]  ;;  %v387_v56 = vld [vmem:[%s1277_s2 + $0x1c0] sm:$0xff]  ;;  %v386_v60 = vld [vmem:[%s1277_s2 + $0x1b8] sm:$0xff] }
  0x44   :  { %v339_v57 = vld [vmem:[%s1277_s2 + $0x40] sm:$0xff]  ;;  %v338_v61 = vld [vmem:[%s1277_s2 + $0x38] sm:$0xff]  ;;  %v353_v63 = vld [vmem:[%s1277_s2 + $0xb0] sm:$0xff] }
  0x45   :  { %v371_v58 = vld [vmem:[%s1277_s2 + $0x140] sm:$0xff]  ;;  %v370_v62 = vld [vmem:[%s1277_s2 + $0x138] sm:$0xff]  ;;  %v385_v1 = vld [vmem:[%s1277_s2 + $0x1b0] sm:$0xff] }
  0x46   :  { %v337_v2 = vld [vmem:[%s1277_s2 + $0x30] sm:$0xff]  ;;  %v352_v4 = vld [vmem:[%s1277_s2 + $0xa8] sm:$0xff]  ;;  %v351_v9 = vld [vmem:[%s1277_s2 + $0xa0] sm:$0xff] }
  0x47   :  { %v369_v3 = vld [vmem:[%s1277_s2 + $0x130] sm:$0xff]  ;;  %v384_v5 = vld [vmem:[%s1277_s2 + $0x1a8] sm:$0xff]  ;;  %v383_v10 = vld [vmem:[%s1277_s2 + $0x1a0] sm:$0xff] }
  0x48   :  { %v336_v6 = vld [vmem:[%s1277_s2 + $0x28] sm:$0xff]  ;;  %v335_v11 = vld [vmem:[%s1277_s2 + $0x20] sm:$0xff]  ;;  %v350_v13 = vld [vmem:[%s1277_s2 + $0x98] sm:$0xff] }
  0x49   :  { %v368_v7 = vld [vmem:[%s1277_s2 + $0x128] sm:$0xff]  ;;  %v367_v12 = vld [vmem:[%s1277_s2 + $0x120] sm:$0xff]  ;;  %v382_v14 = vld [vmem:[%s1277_s2 + $0x198] sm:$0xff] }
  0x4a   :  { %v334_v15 = vld [vmem:[%s1277_s2 + $0x18] sm:$0xff]  ;;  %v349_v17 = vld [vmem:[%s1277_s2 + $0x90] sm:$0xff]  ;;  %v380_v23 = vld [vmem:[%s1277_s2 + $0x188] sm:$0xff] }
  0x4b   :  { %v366_v16 = vld [vmem:[%s1277_s2 + $0x118] sm:$0xff]  ;;  %v381_v18 = vld [vmem:[%s1277_s2 + $0x190] sm:$0xff]  ;;  %v332_v24 = vld [vmem:[%s1277_s2 + $0x8] sm:$0xff] }
  0x4c   :  { %v333_v19 = vld [vmem:[%s1277_s2 + $0x10] sm:$0xff]  ;;  %v364_v25 = vld [vmem:[%s1277_s2 + $0x108] sm:$0xff] }
  0x97   :  { %v33_v21 = vpop.xlane.xlu0 %32 }
  0x98   :  { %v34_v22 = vmax.f32 %v33_v21, 1e-30  ;;  %v365_v21 = vld [vmem:[%s1277_s2 + $0x110] sm:$0xff] }
  0x9a   :  { %628 = vrsqrt.f32 %v34_v22  ;;  %v348_v22 = vld [vmem:[%s1277_s2 + $0x88] sm:$0xff] }
  0xa7   :  { %v629_v27 = vpop.eup %628 }
  0xa8   :  { %v43_v28 = vrot.slane %v629_v27, %v42_v26  ;;  %v347_v26 = vld [vmem:[%s1277_s2 + $0x80] sm:$0xff] }
  0xa9   :  { %v379_v27 = vld [vmem:[%s1277_s2 + $0x180] sm:$0xff] }
  0xaa   :  { %v45_v29 = vmul.f32 %v43_v28, %v680_v0  ;;  %v393_v0 = vld [vmem:[%s1277_s2 + $0x1f0] sm:$0xff]  ;;  %v331_v28 = vld [vmem:[%s1277_s2] sm:$0xff] }
  0xac   :  { %v181_v30 = vrot.slane %v45_v29, %v726_v20  ;;  %v345_v20 = vld [vmem:[%s1277_s2 + $0x70] sm:$0xff]  ;;  %v363_v29 = vld [vmem:[%s1277_s2 + $0x100] sm:$0xff]  ;;  %s656_s2 = smov [#allocation2]  }
  0xad   :  { %s547_s28 = sshll.u32 %s656_s2, 4  ;;  %s548_s28 = int_to_ptr.vmem [resolvable:$true] %s547_s28 }
  0xae   :  { %v182_v31 = vcombine.high %v181_v30, %v181_v30  ;;  %s632_s29 = scalar_lea.vmem %s548_s28, 32  ;;  %p637_p1 = scmp.lt.s32.totalorder %s548_s28, %s548_s28 }
  0xaf   :  { %p633_p0 = scmp.ne.s32.totalorder %s548_s28, %s632_s29  ;;  %p638_p2 = scmp.lt.s32.totalorder %s632_s29, %s632_s29 }
  0xb0   :  { %249 = vmatprep.mubr.f32.mxu0 %v182_v31  ;;  %320 = vmatprep.mubr.f32.mxu1 %v182_v31 }
  0xb1   :  { %250 = vmatmul.mubr.f32.vlgmr.msra.gmra.mxu0 %v181_v30  ;;  %321 = vmatmul.mubr.f32.vlgmr.msra.gmra.mxu1 %v181_v30  ;;  %p639_p3 = por %p638_p2, %p637_p1 }
  0xb2   :  { %556 = vmatpush3.msra.mxu0 %v346_v32  ;;  %591 = vmatpush3.msra.mxu1 %v378_v33 }
  0xb3   :  { %557 = vmatprep.subr.mxu0 %v361_v8  ;;  %592 = vmatprep.subr.mxu1 %v393_v0  ;;  %p640_p4 = pnand %p639_p3, %p633_p0 }
  0xb4   :  { %558 = vmatpush3.msra.mxu0 %v345_v20  ;;  %593 = vmatpush3.msra.mxu1 %v377_v34 }
  0xb5   :  { %559 = vmatprep.subr.mxu0 %v360_v35  ;;  %594 = vmatprep.subr.mxu1 %v392_v36 }
  0xb6   :  { %560 = vmatpush3.msra.mxu0 %v344_v37  ;;  %595 = vmatpush3.msra.mxu1 %v376_v38 }
  0xb7   :  { %561 = vmatprep.subr.mxu0 %v359_v39  ;;  %596 = vmatprep.subr.mxu1 %v391_v40 }
  0xb8   :  { %562 = vmatpush3.msra.mxu0 %v343_v41  ;;  %597 = vmatpush3.msra.mxu1 %v375_v42 }
  0xb9   :  { %563 = vmatprep.subr.mxu0 %v358_v43  ;;  %598 = vmatprep.subr.mxu1 %v390_v44 }
  0xba   :  { %564 = vmatpush3.msra.mxu0 %v342_v45  ;;  %599 = vmatpush3.msra.mxu1 %v374_v46 }
  0xbb   :  { %565 = vmatprep.subr.mxu0 %v357_v47  ;;  %600 = vmatprep.subr.mxu1 %v389_v48 }
  0xbc   :  { %566 = vmatpush3.msra.mxu0 %v341_v49  ;;  %601 = vmatpush3.msra.mxu1 %v373_v50 }
  0xbd   :  { %567 = vmatprep.subr.mxu0 %v356_v51  ;;  %602 = vmatprep.subr.mxu1 %v388_v52 }
  0xbe   :  { %568 = vmatpush3.msra.mxu0 %v340_v53  ;;  %603 = vmatpush3.msra.mxu1 %v372_v54 }
  0xbf   :  { %569 = vmatprep.subr.mxu0 %v355_v55  ;;  %604 = vmatprep.subr.mxu1 %v387_v56 }
  0xc0   :  { %570 = vmatpush3.msra.mxu0 %v339_v57  ;;  %605 = vmatpush3.msra.mxu1 %v371_v58 }
  0xc1   :  { %571 = vmatprep.subr.mxu0 %v354_v59  ;;  %606 = vmatprep.subr.mxu1 %v386_v60 }
  0xc2   :  { %572 = vmatpush3.msra.mxu0 %v338_v61  ;;  %607 = vmatpush3.msra.mxu1 %v370_v62 }
  0xc3   :  { %573 = vmatprep.subr.mxu0 %v353_v63  ;;  %608 = vmatprep.subr.mxu1 %v385_v1 }
  0xc4   :  { %574 = vmatpush3.msra.mxu0 %v337_v2  ;;  %609 = vmatpush3.msra.mxu1 %v369_v3 }
  0xc5   :  { %575 = vmatprep.subr.mxu0 %v352_v4  ;;  %610 = vmatprep.subr.mxu1 %v384_v5 }
  0xc6   :  { %576 = vmatpush3.msra.mxu0 %v336_v6  ;;  %611 = vmatpush3.msra.mxu1 %v368_v7 }
  0xc7   :  { %577 = vmatprep.subr.mxu0 %v351_v9  ;;  %612 = vmatprep.subr.mxu1 %v383_v10 }
  0xc8   :  { %578 = vmatpush3.msra.mxu0 %v335_v11  ;;  %613 = vmatpush3.msra.mxu1 %v367_v12 }
  0xc9   :  { %579 = vmatprep.subr.mxu0 %v350_v13  ;;  %614 = vmatprep.subr.mxu1 %v382_v14 }
  0xca   :  { %580 = vmatpush3.msra.mxu0 %v334_v15  ;;  %615 = vmatpush3.msra.mxu1 %v366_v16 }
  0xcb   :  { %581 = vmatprep.subr.mxu0 %v349_v17  ;;  %616 = vmatprep.subr.mxu1 %v381_v18 }
  0xcc   :  { %582 = vmatpush3.msra.mxu0 %v333_v19  ;;  %617 = vmatpush3.msra.mxu1 %v365_v21 }
  0xcd   :  { %583 = vmatprep.subr.mxu0 %v348_v22  ;;  %618 = vmatprep.subr.mxu1 %v380_v23 }
  0xce   :  { %584 = vmatpush3.msra.mxu0 %v332_v24  ;;  %619 = vmatpush3.msra.mxu1 %v364_v25 }
  0xcf   :  { %585 = vmatprep.subr.mxu0 %v347_v26  ;;  %620 = vmatprep.subr.mxu1 %v379_v27 }
  0xd0   :  { %586 = vmatpush3.msra.mxu0 %v331_v28  ;;  %621 = vmatpush3.msra.mxu1 %v363_v29 }
 0x171   :  { %v251_v30 = vpop.f32.mrf.mxu0  ;;  %v322_v31 = vpop.f32.mrf.mxu1 }
 0x172   :  { %v327_v20 = vmul.f32 %v251_v30, %v251_v30  ;;  %v329_v34 = vmul.f32 %v322_v31, %v322_v31 }
 0x173   :  { %v253_v32 = vpop.f32.mrf.mxu0  ;;  %v324_v33 = vpop.f32.mrf.mxu1 }
 0x174   :  { %v328_v8 = vmul.f32 %v253_v32, %v253_v32  ;;  %v330_v0 = vmul.f32 %v324_v33, %v324_v33 }
 0x176   :  { %459 = vmatprep.mubr.f32.mxu0 %v328_v8  ;;  %529 = vmatprep.mubr.f32.mxu1 %v330_v0 }
 0x177   :  { %460 = vmatmul.mubr.f32.vlgmr.msra.gmra.mxu0 %v327_v20  ;;  %530 = vmatmul.mubr.f32.vlgmr.msra.gmra.mxu1 %v329_v34 }
 0x237   :  { %v587_v35 = vpop.f32.mrf.mxu0  ;;  %v622_v36 = vpop.f32.mrf.mxu1 }
 0x239   :  { %v588_v37 = vpop.f32.mrf.mxu0  ;;  %v623_v38 = vpop.f32.mrf.mxu1 }
 0x23a   :  { %v589_v39 = vadd.f32 %v588_v37, %v587_v35  ;;  %v624_v40 = vadd.f32 %v623_v38, %v622_v36 }
 0x23c   :  { %v532_v41 = vadd.f32 %v624_v40, %v589_v39 }
 0x23e   :  { %v535_v42 = vsel %vm28_vm0, %v532_v41, 0.0 }
 0x23f   :  { %536 = vadd.xlane.f32.xlu0 %v535_v42 }
 0x2c8   :  { %v537_v43 = vpop.xlane.xlu0 %536 }
 0x2c9   :  { %630 = vrcp.f32 %v537_v43 }
 0x2d6   :  { %v631_v44 = vpop.eup %630 }
 0x2d7   :  { %v539_v45 = vmul.f32 %v631_v44, %v532_v41 }
 0x2d9   :  { %540 = vst [vmem:[#allocation2] sm:$0x3] %v539_v45 }
 0x2da   :  { %643 = shalt.err (!%p640_p4)
}
 0x2db   :  { %550 = dma.vmem_to_hbm [thread:$0]  %s548_s28, 32, %s1278_s3, [#allocation3]  }
 0x2dc   :  { %652 = dma.done.wait [#allocation3], 32  }
 0x2dd   :  { %653 = vsyncadd [#allocation3], 4294967264 }
 0x2de   :  { %554 = vsyncpa [#allocation3], 1 }

</bundles_post_ra>
